<compile_context>
chip_gen: v7x
topology: tpu7x:2x2x1
jax: 0.10.0
libtpu: 0.0.40
codegen_flags: <defaults>
</compile_context>

<pallas_src>
import functools
import math

import jax
import jax.numpy as jnp
from jax.experimental import pallas as pl
from jax.experimental.pallas import tpu as pltpu


# --------------------------- VMEM budgeting -------------------------------- #

def _tpu_vmem_budget_bytes():
    """Usable VMEM budget derived from the actual chip generation."""
    cap = 128 * 1024 * 1024
    try:
        info = pltpu.get_tpu_info()
        cap = int(getattr(info, "vmem_capacity_bytes", cap) or cap)
    except Exception:
        pass
    # Leave ~25% headroom for compiler-internal scratch, semaphores, params.
    return max(16 * 1024 * 1024, (cap * 3) // 4)


# ----------------------------- fused kernel -------------------------------- #

def _fused_kernel(x_ref, prm_ref, w1f_ref, w1p_ref, b1_ref, w2t_ref, b2t_ref,
                  out_ref, *, K, S):
    # x_ref:   (1, K, C, S)   one batch slab (native dtype), S on lane axis
    # prm_ref: (1, K, 1, S)
    # w1f_ref: (K, C, HID)    first 1x1x1-conv weight, feature part (f32)
    # w1p_ref: (1, HID)       first conv weight, prm row (f32)
    # b1_ref:  (1, HID)
    # w2t_ref: (K, 1, HID)    second conv weight, transposed (f32)
    # b2t_ref: (K, 1, 1)
    # out_ref: (1, C, S)      native dtype
    inv_s = 1.0 / S

    # --- spatial means (lane reductions over S), accumulated in f32 -------- #
    prm_avg = []   # each (1, 1)
    feat = []      # each (C, 1)
    for k in range(K):
        p_k = (jnp.sum(prm_ref[0, k].astype(jnp.float32), axis=-1,
                       keepdims=True) * inv_s + 1e-7)
        x_k = (jnp.sum(x_ref[0, k].astype(jnp.float32), axis=-1,
                       keepdims=True) * inv_s)
        prm_avg.append(p_k)
        feat.append(x_k * pl.reciprocal(p_k, approx=True))   # mean(x)/(mean(prm)+eps)

    # --- tiny 1x1x1-conv MLP on the VPU (no MXU, no in-kernel reshapes) ---- #
    h = b1_ref[...] + prm_avg[0] * w1p_ref[...]                      # (1, HID)
    for k in range(K):
        h = h + jnp.sum(feat[k] * w1f_ref[k], axis=0, keepdims=True)
    h = jnp.where(h > 0, h, 0.2 * h)                                 # LeakyReLU(0.2)

    # --- layer 2 + sigmoid, weighted modality sum straight into out_ref ---- #
    for k in range(K):
        logit_k = jnp.sum(h * w2t_ref[k], axis=-1, keepdims=True)    # (1, 1)
        w_k = jax.nn.sigmoid(logit_k + b2t_ref[k])                   # (1, 1) f32
        term = (w_k * x_ref[0, k].astype(jnp.float32)).astype(out_ref.dtype)
        if k == 0:
            out_ref[0] = term
        else:
            out_ref[0] += term


def _fused_path(x4, prm4, w1, b1, w2, b2, B, K, C, S, HID, *,
                vmem_limit, single_buffer=False):
    # Pre-shape the tiny MLP parameters in plain JAX (free) so the kernel
    # only ever indexes leading (untiled) ref dims; params kept in f32.
    w1f = w1[:K * C].reshape(K, C, HID).astype(jnp.float32)
    w1p = w1[K * C:K * C + 1].reshape(1, HID).astype(jnp.float32)
    b1r = b1.reshape(1, HID).astype(jnp.float32)
    w2t = w2.T.reshape(K, 1, HID).astype(jnp.float32)
    b2t = b2.reshape(K, 1, 1).astype(jnp.float32)

    big_kw = {}
    if single_buffer and hasattr(pl, "Buffered"):
        # v7x (64 MiB VMEM): keep the single-HBM-read path alive by dropping
        # input prefetch double-buffering on the big slabs. Compute here is a
        # small fraction of DMA time, so the lost overlap costs a few percent
        # while ~doubling the largest S this path can handle.
        big_kw = dict(pipeline_mode=pl.Buffered(1))

    # NOTE: grid=(B,) "parallel" feeds megacore; for B == 1 on v7x the second
    # TensorCore is idle — the S-parallel two-pass pass-2 layout covers that.
    return pl.pallas_call(
        functools.partial(_fused_kernel, K=K, S=S),
        grid=(B,),
        in_specs=[
            pl.BlockSpec((1, K, C, S), lambda b: (b, 0, 0, 0), **big_kw),
            pl.BlockSpec((1, K, 1, S), lambda b: (b, 0, 0, 0), **big_kw),
            pl.BlockSpec((K, C, HID), lambda b: (0, 0, 0)),
            pl.BlockSpec((1, HID), lambda b: (0, 0)),
            pl.BlockSpec((1, HID), lambda b: (0, 0)),
            pl.BlockSpec((K, 1, HID), lambda b: (0, 0, 0)),
            pl.BlockSpec((K, 1, 1), lambda b: (0, 0, 0)),
        ],
        out_specs=pl.BlockSpec((1, C, S), lambda b: (b, 0, 0)),
        out_shape=jax.ShapeDtypeStruct((B, C, S), x4.dtype),
        compiler_params=pltpu.CompilerParams(
            dimension_semantics=("parallel",),
            vmem_limit_bytes=vmem_limit),
    )(x4, prm4, w1f, w1p, b1r, w2t, b2t)


# ----------------------- two-pass, S-tiled fallback ------------------------ #
# For volumes where a whole (K, C, S) slab does not fit the per-chip VMEM
# budget even single-buffered, the mean must be known before the weighted
# sum, so x is streamed twice with large S-tiled blocks.

def _reduce_tiled_kernel(x_ref, prm_ref, xsum_ref, psum_ref, *, S, ts, ragged):
    # x_ref: (1, K*C, ts); prm_ref: (1, K, ts); outputs resident over S axis.
    @pl.when(pl.program_id(1) == 0)
    def _():
        xsum_ref[...] = jnp.zeros_like(xsum_ref)
        psum_ref[...] = jnp.zeros_like(psum_ref)

    x = x_ref[0].astype(jnp.float32)
    p = prm_ref[0].astype(jnp.float32)
    if ragged:
        valid = S - pl.program_id(1) * ts
        xi = jax.lax.broadcasted_iota(jnp.int32, x.shape, 1)
        pi = jax.lax.broadcasted_iota(jnp.int32, p.shape, 1)
        x = jnp.where(xi < valid, x, 0.0)
        p = jnp.where(pi < valid, p, 0.0)

    xsum_ref[0] += jnp.sum(x, axis=-1, keepdims=True)
    psum_ref[0] += jnp.sum(p, axis=-1, keepdims=True)


def _weighted_tiled_kernel(w_ref, x_ref, out_ref, *, K):
    # w_ref: (B, K) f32 in SMEM; x_ref: (1, K, C, ts); out_ref: (1, C, ts).
    # Out-of-range lanes of a ragged last tile are dropped on the output
    # write, so no masking is needed here.
    b = pl.program_id(0)
    for k in range(K):
        term = (w_ref[b, k] * x_ref[0, k].astype(jnp.float32)).astype(out_ref.dtype)
        if k == 0:
            out_ref[0] = term
        else:
            out_ref[0] += term


def _pick_ts(S, K, C, x_itemsize, p_itemsize, budget):
    """Largest power-of-two lane tile (multiple of 128) whose double-buffered
    per-step footprint stays well inside the VMEM budget."""
    s_pad = -(-S // 128) * 128
    best = 128
    for ts in (128, 256, 512, 1024, 2048, 4096, 8192, 16384,
               32768, 65536, 131072):
        step1 = 2 * (K * C * x_itemsize + K * p_itemsize) * ts        # pass 1
        step2 = 2 * (K * C * x_itemsize + C * x_itemsize) * ts        # pass 2
        if max(step1, step2) <= budget // 2:
            best = ts
        if ts >= s_pad:
            break
    return min(best, max(s_pad, 128))


def _two_pass_path(x4, prm4, w1, b1, w2, b2, B, K, C, S, HID, *, ts, budget):
    out_dtype = x4.dtype
    if ts is None:
        ts = _pick_ts(S, K, C, x4.dtype.itemsize, prm4.dtype.itemsize, budget)
    n_s = pl.cdiv(S, ts)
    ragged = (S % ts) != 0

    # Pass 1: spatial sums of x and prm (f32 accumulation), K folded into the
    # sublane axis so the grid is only (B, n_s).
    x3 = x4.reshape(B, K * C, S)
    prm3 = prm4.reshape(B, K, S)
    xsum, psum = pl.pallas_call(
        functools.partial(_reduce_tiled_kernel, S=S, ts=ts, ragged=ragged),
        grid=(B, n_s),
        in_specs=[
            pl.BlockSpec((1, K * C, ts), lambda b, j: (b, 0, j)),
            pl.BlockSpec((1, K, ts), lambda b, j: (b, 0, j)),
        ],
        out_specs=[
            pl.BlockSpec((1, K * C, 1), lambda b, j: (b, 0, 0)),
            pl.BlockSpec((1, K, 1), lambda b, j: (b, 0, 0)),
        ],
        out_shape=[
            jax.ShapeDtypeStruct((B, K * C, 1), jnp.float32),
            jax.ShapeDtypeStruct((B, K, 1), jnp.float32),
        ],
        compiler_params=pltpu.CompilerParams(
            dimension_semantics=("parallel", "arbitrary"),
            vmem_limit_bytes=budget),
    )(x3, prm3)

    # Tiny MLP in plain JAX: (B, K*C+1) @ (K*C+1, 128) @ (128, K) is far below
    # MXU granularity; a dedicated Pallas launch costs more than it saves.
    inv_s = 1.0 / S
    prm_avg = psum.reshape(B, K) * inv_s + 1e-7
    feat_avg = xsum.reshape(B, K, C) * inv_s / prm_avg[:, :, None]
    feat_in = jnp.concatenate(
        [feat_avg.reshape(B, K * C), prm_avg[:, 0:1]], axis=1)
    h = feat_in @ w1.astype(jnp.float32) + b1.reshape(1, HID).astype(jnp.float32)
    h = jnp.where(h > 0, h, 0.2 * h)
    weight = jax.nn.sigmoid(
        h @ w2.astype(jnp.float32) + b2.reshape(1, K).astype(jnp.float32))

    # Pass 2: weighted modality sum; weights read as scalars from SMEM.
    out = pl.pallas_call(
        functools.partial(_weighted_tiled_kernel, K=K),
        grid=(B, n_s),
        in_specs=[
            pl.BlockSpec(memory_space=pltpu.MemorySpace.SMEM),
            pl.BlockSpec((1, K, C, ts), lambda b, j: (b, 0, 0, j)),
        ],
        out_specs=pl.BlockSpec((1, C, ts), lambda b, j: (b, 0, j)),
        out_shape=jax.ShapeDtypeStruct((B, C, S), out_dtype),
        compiler_params=pltpu.CompilerParams(
            dimension_semantics=("parallel", "parallel"),
            vmem_limit_bytes=budget),
    )(weight, x4)
    return out


# ----------------------------- wrapper ------------------------------------- #

def modal_fusion_forward(x, prm, params, *, force_two_pass=False, ts=None):
    w1, b1, w2, b2 = params
    B, K, C, H, W, Z = x.shape
    S = H * W * Z
    HID = w1.shape[1]
    assert w1.shape[0] == K * C + 1

    # Native dtype all the way: no wrapper astype, no extra HBM pass.
    x4 = x.reshape(B, K, C, S)
    prm4 = prm.reshape(B, K, 1, S)

    budget = _tpu_vmem_budget_bytes()
    x_isz = x4.dtype.itemsize
    p_isz = prm4.dtype.itemsize
    x_b = K * C * S * x_isz
    p_b = K * S * p_isz
    o_b = C * S * x_isz
    param_b = ((K * C + 1) * HID + HID + K * HID + K) * 4
    headroom = 2 * 1024 * 1024
    need_db = 2 * (x_b + p_b + o_b) + 2 * param_b + headroom   # double-buffered
    need_sb = (x_b + p_b) + 2 * o_b + 2 * param_b + headroom   # Buffered(1) inputs

    if force_two_pass:
        out = _two_pass_path(x4, prm4, w1, b1, w2, b2, B, K, C, S, HID,
                             ts=ts, budget=budget)
    elif need_db <= budget:
        out = _fused_path(x4, prm4, w1, b1, w2, b2, B, K, C, S, HID,
                          vmem_limit=budget, single_buffer=False)
    elif need_sb <= budget and hasattr(pl, "Buffered"):
        out = _fused_path(x4, prm4, w1, b1, w2, b2, B, K, C, S, HID,
                          vmem_limit=budget, single_buffer=True)
    else:
        out = _two_pass_path(x4, prm4, w1, b1, w2, b2, B, K, C, S, HID,
                             ts=ts, budget=budget)
    return out.reshape(B, C, H, W, Z)


# ----------------------------- reference ----------------------------------- #

def modal_fusion_ref(x, prm, params):
    w1, b1, w2, b2 = params
    B, K, C, H, W, Z = x.shape
    prm_avg = jnp.mean(prm, axis=(3, 4, 5)) + 1e-7            # (B, K, 1)
    feat_avg = jnp.mean(x, axis=(3, 4, 5)) / prm_avg          # (B, K, C)
    feat_in = jnp.concatenate(
        [feat_avg.reshape(B, K * C), prm_avg[:, 0, 0:1]], axis=1)
    h = feat_in @ w1 + b1
    h = jnp.where(h > 0, h, 0.2 * h)                          # LeakyReLU(0.2)
    wgt = jax.nn.sigmoid(h @ w2 + b2)                         # (B, K)
    return jnp.sum(x * wgt[:, :, None, None, None, None], axis=1)


# ------------------------------- main --------------------------------------- #

if __name__ == "__main__":
    # Small shapes consistent with modal_fusion: C per modality = 4, K = 3.
    B, K, C, H, W, Z = 2, 3, 4, 8, 8, 8
    HID = 128
    DIN = K * C + 1

    key = jax.random.PRNGKey(0)
    kx, kp, k1, k2, k3, k4 = jax.random.split(key, 6)

    x = jax.random.normal(kx, (B, K, C, H, W, Z), dtype=jnp.float32)
    prm = jax.random.uniform(kp, (B, K, 1, H, W, Z), dtype=jnp.float32,
                             minval=0.1, maxval=1.0)

    # Deterministic synthetic parameters (Conv3d 1x1x1 == dense matrices).
    w1 = jax.random.normal(k1, (DIN, HID), dtype=jnp.float32) / math.sqrt(DIN)
    b1 = jax.random.normal(k2, (1, HID), dtype=jnp.float32) * 0.01
    w2 = jax.random.normal(k3, (HID, K), dtype=jnp.float32) / math.sqrt(HID)
    b2 = jax.random.normal(k4, (1, K), dtype=jnp.float32) * 0.01
    params = (w1, b1, w2, b2)

    ref = modal_fusion_ref(x, prm, params)

    # 1) Fused single-launch path (default for shapes that fit VMEM).
    out_fused = jax.block_until_ready(modal_fusion_forward(x, prm, params))
    assert out_fused.shape == (B, C, H, W, Z)
    assert jnp.allclose(out_fused, ref, atol=5e-4, rtol=5e-4), \
        "fused path mismatch vs reference"

    # 2) Two-pass S-tiled fallback, forced with a small tile so the reduction
    #    really accumulates over multiple S tiles.
    out_tiled = jax.block_until_ready(
        modal_fusion_forward(x, prm, params, force_two_pass=True, ts=128))
    assert jnp.allclose(out_tiled, ref, atol=5e-4, rtol=5e-4), \
        "two-pass path mismatch vs reference"

    # 3) Native bf16 inputs (production dtype): kernel casts per-tile,
    #    accumulates the means in f32 and emits a bf16 output.
    x_bf = x.astype(jnp.bfloat16)
    prm_bf = prm.astype(jnp.bfloat16)
    ref_bf = modal_fusion_ref(x_bf.astype(jnp.float32),
                              prm_bf.astype(jnp.float32), params)
    out_bf = jax.block_until_ready(modal_fusion_forward(x_bf, prm_bf, params))
    assert out_bf.dtype == jnp.bfloat16
    err = jnp.max(jnp.abs(out_bf.astype(jnp.float32) - ref_bf))
    assert bool(jnp.isfinite(err)) and float(err) < 0.1, \
        "bf16 path mismatch vs reference"

    print("KERNEL_OK")
</pallas_src>

<mosaic_0001>
module attributes {stable_mosaic.version = 11 : i64} {
  func.func @_fused_kernel(%arg0: i32, %arg1: memref<1x3x4x512xf32, #tpu.memory_space<vmem>>, %arg2: memref<1x3x1x512xf32, #tpu.memory_space<vmem>>, %arg3: memref<3x4x128xf32, #tpu.memory_space<vmem>>, %arg4: memref<1x128xf32, #tpu.memory_space<vmem>>, %arg5: memref<1x128xf32, #tpu.memory_space<vmem>>, %arg6: memref<3x1x128xf32, #tpu.memory_space<vmem>>, %arg7: memref<3x1x1xf32, #tpu.memory_space<vmem>>, %arg8: memref<1x4x512xf32, #tpu.memory_space<vmem>>) attributes {dimension_semantics = [#tpu.dimension_semantics<parallel>], iteration_bounds = array<i64: 2>, scalar_prefetch = 0 : i64, scratch_operands = 0 : i64, tpu.core_type = #tpu.core_type<tc>, window_params = [{transform_indices = @transform_0, window_bounds = array<i64: 1, 3, 4, 512>}, {transform_indices = @transform_1, window_bounds = array<i64: 1, 3, 1, 512>}, {pipeline_mode = #tpu.pipeline_mode<synchronous>, transform_indices = @transform_2, window_bounds = array<i64: 3, 4, 128>}, {pipeline_mode = #tpu.pipeline_mode<synchronous>, transform_indices = @transform_3, window_bounds = array<i64: 1, 128>}, {pipeline_mode = #tpu.pipeline_mode<synchronous>, transform_indices = @transform_4, window_bounds = array<i64: 1, 128>}, {pipeline_mode = #tpu.pipeline_mode<synchronous>, transform_indices = @transform_5, window_bounds = array<i64: 3, 1, 128>}, {pipeline_mode = #tpu.pipeline_mode<synchronous>, transform_indices = @transform_6, window_bounds = array<i64: 3, 1, 1>}, {transform_indices = @transform_7, window_bounds = array<i64: 1, 4, 512>}]} {
    %c0 = arith.constant 0 : index
    %c0_0 = arith.constant 0 : index
    %c0_1 = arith.constant 0 : index
    %c0_2 = arith.constant 0 : index
    %0 = vector.load %arg2[%c0, %c0_0, %c0_1, %c0_2] : memref<1x3x1x512xf32, #tpu.memory_space<vmem>>, vector<1x1x1x512xf32>
    %1 = vector.shape_cast %0 : vector<1x1x1x512xf32> to vector<1x512xf32>
    %cst = arith.constant dense<0.000000e+00> : vector<1xf32>
    %2 = vector.multi_reduction <add>, %1, %cst [1] : vector<1x512xf32> to vector<1xf32>
    %3 = vector.shape_cast %2 : vector<1xf32> to vector<1x1xf32>
    %cst_3 = arith.constant 0.001953125 : f32
    %4 = vector.broadcast %cst_3 : f32 to vector<1x1xf32>
    %5 = arith.mulf %3, %4 : vector<1x1xf32>
    %cst_4 = arith.constant 1.000000e-07 : f32
    %6 = vector.broadcast %cst_4 : f32 to vector<1x1xf32>
    %7 = arith.addf %5, %6 : vector<1x1xf32>
    %c0_5 = arith.constant 0 : index
    %c0_6 = arith.constant 0 : index
    %c0_7 = arith.constant 0 : index
    %c0_8 = arith.constant 0 : index
    %8 = vector.load %arg1[%c0_5, %c0_6, %c0_7, %c0_8] : memref<1x3x4x512xf32, #tpu.memory_space<vmem>>, vector<1x1x4x512xf32>
    %9 = vector.shape_cast %8 : vector<1x1x4x512xf32> to vector<4x512xf32>
    %cst_9 = arith.constant dense<0.000000e+00> : vector<4xf32>
    %10 = vector.multi_reduction <add>, %9, %cst_9 [1] : vector<4x512xf32> to vector<4xf32>
    %11 = vector.shape_cast %10 : vector<4xf32> to vector<4x1xf32>
    %cst_10 = arith.constant 0.001953125 : f32
    %12 = vector.broadcast %cst_10 : f32 to vector<4x1xf32>
    %13 = arith.mulf %11, %12 : vector<4x1xf32>
    %14 = tpu.reciprocal %7 {approx = true} : vector<1x1xf32> -> vector<1x1xf32>
    %15 = vector.broadcast %14 : vector<1x1xf32> to vector<4x1xf32>
    %16 = arith.mulf %13, %15 : vector<4x1xf32>
    %c0_11 = arith.constant 0 : index
    %c1 = arith.constant 1 : index
    %c0_12 = arith.constant 0 : index
    %c0_13 = arith.constant 0 : index
    %17 = vector.load %arg2[%c0_11, %c1, %c0_12, %c0_13] : memref<1x3x1x512xf32, #tpu.memory_space<vmem>>, vector<1x1x1x512xf32>
    %18 = vector.shape_cast %17 : vector<1x1x1x512xf32> to vector<1x512xf32>
    %cst_14 = arith.constant dense<0.000000e+00> : vector<1xf32>
    %19 = vector.multi_reduction <add>, %18, %cst_14 [1] : vector<1x512xf32> to vector<1xf32>
    %20 = vector.shape_cast %19 : vector<1xf32> to vector<1x1xf32>
    %cst_15 = arith.constant 0.001953125 : f32
    %21 = vector.broadcast %cst_15 : f32 to vector<1x1xf32>
    %22 = arith.mulf %20, %21 : vector<1x1xf32>
    %cst_16 = arith.constant 1.000000e-07 : f32
    %23 = vector.broadcast %cst_16 : f32 to vector<1x1xf32>
    %24 = arith.addf %22, %23 : vector<1x1xf32>
    %c0_17 = arith.constant 0 : index
    %c1_18 = arith.constant 1 : index
    %c0_19 = arith.constant 0 : index
    %c0_20 = arith.constant 0 : index
    %25 = vector.load %arg1[%c0_17, %c1_18, %c0_19, %c0_20] : memref<1x3x4x512xf32, #tpu.memory_space<vmem>>, vector<1x1x4x512xf32>
    %26 = vector.shape_cast %25 : vector<1x1x4x512xf32> to vector<4x512xf32>
    %cst_21 = arith.constant dense<0.000000e+00> : vector<4xf32>
    %27 = vector.multi_reduction <add>, %26, %cst_21 [1] : vector<4x512xf32> to vector<4xf32>
    %28 = vector.shape_cast %27 : vector<4xf32> to vector<4x1xf32>
    %cst_22 = arith.constant 0.001953125 : f32
    %29 = vector.broadcast %cst_22 : f32 to vector<4x1xf32>
    %30 = arith.mulf %28, %29 : vector<4x1xf32>
    %31 = tpu.reciprocal %24 {approx = true} : vector<1x1xf32> -> vector<1x1xf32>
    %32 = vector.broadcast %31 : vector<1x1xf32> to vector<4x1xf32>
    %33 = arith.mulf %30, %32 : vector<4x1xf32>
    %c0_23 = arith.constant 0 : index
    %c2 = arith.constant 2 : index
    %c0_24 = arith.constant 0 : index
    %c0_25 = arith.constant 0 : index
    %34 = vector.load %arg2[%c0_23, %c2, %c0_24, %c0_25] : memref<1x3x1x512xf32, #tpu.memory_space<vmem>>, vector<1x1x1x512xf32>
    %35 = vector.shape_cast %34 : vector<1x1x1x512xf32> to vector<1x512xf32>
    %cst_26 = arith.constant dense<0.000000e+00> : vector<1xf32>
    %36 = vector.multi_reduction <add>, %35, %cst_26 [1] : vector<1x512xf32> to vector<1xf32>
    %37 = vector.shape_cast %36 : vector<1xf32> to vector<1x1xf32>
    %cst_27 = arith.constant 0.001953125 : f32
    %38 = vector.broadcast %cst_27 : f32 to vector<1x1xf32>
    %39 = arith.mulf %37, %38 : vector<1x1xf32>
    %cst_28 = arith.constant 1.000000e-07 : f32
    %40 = vector.broadcast %cst_28 : f32 to vector<1x1xf32>
    %41 = arith.addf %39, %40 : vector<1x1xf32>
    %c0_29 = arith.constant 0 : index
    %c2_30 = arith.constant 2 : index
    %c0_31 = arith.constant 0 : index
    %c0_32 = arith.constant 0 : index
    %42 = vector.load %arg1[%c0_29, %c2_30, %c0_31, %c0_32] : memref<1x3x4x512xf32, #tpu.memory_space<vmem>>, vector<1x1x4x512xf32>
    %43 = vector.shape_cast %42 : vector<1x1x4x512xf32> to vector<4x512xf32>
    %cst_33 = arith.constant dense<0.000000e+00> : vector<4xf32>
    %44 = vector.multi_reduction <add>, %43, %cst_33 [1] : vector<4x512xf32> to vector<4xf32>
    %45 = vector.shape_cast %44 : vector<4xf32> to vector<4x1xf32>
    %cst_34 = arith.constant 0.001953125 : f32
    %46 = vector.broadcast %cst_34 : f32 to vector<4x1xf32>
    %47 = arith.mulf %45, %46 : vector<4x1xf32>
    %48 = tpu.reciprocal %41 {approx = true} : vector<1x1xf32> -> vector<1x1xf32>
    %49 = vector.broadcast %48 : vector<1x1xf32> to vector<4x1xf32>
    %50 = arith.mulf %47, %49 : vector<4x1xf32>
    %c0_35 = arith.constant 0 : index
    %c0_36 = arith.constant 0 : index
    %51 = vector.load %arg5[%c0_35, %c0_36] : memref<1x128xf32, #tpu.memory_space<vmem>>, vector<1x128xf32>
    %c0_37 = arith.constant 0 : index
    %c0_38 = arith.constant 0 : index
    %52 = vector.load %arg4[%c0_37, %c0_38] : memref<1x128xf32, #tpu.memory_space<vmem>>, vector<1x128xf32>
    %53 = vector.broadcast %7 : vector<1x1xf32> to vector<1x128xf32>
    %54 = arith.mulf %53, %52 : vector<1x128xf32>
    %55 = arith.addf %51, %54 : vector<1x128xf32>
    %c0_39 = arith.constant 0 : index
    %c0_40 = arith.constant 0 : index
    %c0_41 = arith.constant 0 : index
    %56 = vector.load %arg3[%c0_39, %c0_40, %c0_41] : memref<3x4x128xf32, #tpu.memory_space<vmem>>, vector<1x4x128xf32>
    %57 = vector.shape_cast %56 : vector<1x4x128xf32> to vector<4x128xf32>
    %58 = vector.broadcast %16 : vector<4x1xf32> to vector<4x128xf32>
    %59 = arith.mulf %58, %57 : vector<4x128xf32>
    %cst_42 = arith.constant dense<0.000000e+00> : vector<128xf32>
    %60 = vector.multi_reduction <add>, %59, %cst_42 [0] : vector<4x128xf32> to vector<128xf32>
    %61 = vector.shape_cast %60 : vector<128xf32> to vector<1x128xf32>
    %62 = arith.addf %55, %61 : vector<1x128xf32>
    %c1_43 = arith.constant 1 : index
    %c0_44 = arith.constant 0 : index
    %c0_45 = arith.constant 0 : index
    %63 = vector.load %arg3[%c1_43, %c0_44, %c0_45] : memref<3x4x128xf32, #tpu.memory_space<vmem>>, vector<1x4x128xf32>
    %64 = vector.shape_cast %63 : vector<1x4x128xf32> to vector<4x128xf32>
    %65 = vector.broadcast %33 : vector<4x1xf32> to vector<4x128xf32>
    %66 = arith.mulf %65, %64 : vector<4x128xf32>
    %cst_46 = arith.constant dense<0.000000e+00> : vector<128xf32>
    %67 = vector.multi_reduction <add>, %66, %cst_46 [0] : vector<4x128xf32> to vector<128xf32>
    %68 = vector.shape_cast %67 : vector<128xf32> to vector<1x128xf32>
    %69 = arith.addf %62, %68 : vector<1x128xf32>
    %c2_47 = arith.constant 2 : index
    %c0_48 = arith.constant 0 : index
    %c0_49 = arith.constant 0 : index
    %70 = vector.load %arg3[%c2_47, %c0_48, %c0_49] : memref<3x4x128xf32, #tpu.memory_space<vmem>>, vector<1x4x128xf32>
    %71 = vector.shape_cast %70 : vector<1x4x128xf32> to vector<4x128xf32>
    %72 = vector.broadcast %50 : vector<4x1xf32> to vector<4x128xf32>
    %73 = arith.mulf %72, %71 : vector<4x128xf32>
    %cst_50 = arith.constant dense<0.000000e+00> : vector<128xf32>
    %74 = vector.multi_reduction <add>, %73, %cst_50 [0] : vector<4x128xf32> to vector<128xf32>
    %75 = vector.shape_cast %74 : vector<128xf32> to vector<1x128xf32>
    %76 = arith.addf %69, %75 : vector<1x128xf32>
    %cst_51 = arith.constant 0.000000e+00 : f32
    %77 = vector.broadcast %cst_51 : f32 to vector<1x128xf32>
    %78 = arith.cmpf ogt, %76, %77 : vector<1x128xf32>
    %cst_52 = arith.constant 2.000000e-01 : f32
    %79 = vector.broadcast %cst_52 : f32 to vector<1x128xf32>
    %80 = arith.mulf %79, %76 : vector<1x128xf32>
    %81 = arith.select %78, %76, %80 : vector<1x128xi1>, vector<1x128xf32>
    %c0_53 = arith.constant 0 : index
    %c0_54 = arith.constant 0 : index
    %c0_55 = arith.constant 0 : index
    %82 = vector.load %arg6[%c0_53, %c0_54, %c0_55] : memref<3x1x128xf32, #tpu.memory_space<vmem>>, vector<1x1x128xf32>
    %83 = vector.shape_cast %82 : vector<1x1x128xf32> to vector<1x128xf32>
    %84 = arith.mulf %81, %83 : vector<1x128xf32>
    %cst_56 = arith.constant dense<0.000000e+00> : vector<1xf32>
    %85 = vector.multi_reduction <add>, %84, %cst_56 [1] : vector<1x128xf32> to vector<1xf32>
    %86 = vector.shape_cast %85 : vector<1xf32> to vector<1x1xf32>
    %c0_57 = arith.constant 0 : index
    %c0_58 = arith.constant 0 : index
    %c0_59 = arith.constant 0 : index
    %87 = vector.load %arg7[%c0_57, %c0_58, %c0_59] : memref<3x1x1xf32, #tpu.memory_space<vmem>>, vector<1x1x1xf32>
    %88 = vector.shape_cast %87 : vector<1x1x1xf32> to vector<1x1xf32>
    %89 = arith.addf %86, %88 : vector<1x1xf32>
    %90 = arith.negf %89 : vector<1x1xf32>
    %91 = math.exp %90 : vector<1x1xf32>
    %cst_60 = arith.constant 1.000000e+00 : f32
    %92 = vector.broadcast %cst_60 : f32 to vector<1x1xf32>
    %93 = arith.addf %92, %91 : vector<1x1xf32>
    %94 = arith.divf %92, %93 : vector<1x1xf32>
    %c0_61 = arith.constant 0 : index
    %c0_62 = arith.constant 0 : index
    %c0_63 = arith.constant 0 : index
    %c0_64 = arith.constant 0 : index
    %95 = vector.load %arg1[%c0_61, %c0_62, %c0_63, %c0_64] : memref<1x3x4x512xf32, #tpu.memory_space<vmem>>, vector<1x1x4x512xf32>
    %96 = vector.shape_cast %95 : vector<1x1x4x512xf32> to vector<4x512xf32>
    %97 = vector.broadcast %94 : vector<1x1xf32> to vector<4x512xf32>
    %98 = arith.mulf %97, %96 : vector<4x512xf32>
    %c0_65 = arith.constant 0 : index
    %c0_66 = arith.constant 0 : index
    %c0_67 = arith.constant 0 : index
    %99 = vector.load %arg8[%c0_65, %c0_66, %c0_67] : memref<1x4x512xf32, #tpu.memory_space<vmem>>, vector<1x4x512xf32>
    %100 = vector.shape_cast %99 : vector<1x4x512xf32> to vector<4x512xf32>
    %101 = vector.shape_cast %98 : vector<4x512xf32> to vector<1x4x512xf32>
    tpu.vector_store %arg8[%c0_65, %c0_66, %c0_67], %101 {strides = array<i32>} : memref<1x4x512xf32, #tpu.memory_space<vmem>>, vector<1x4x512xf32>,
    %c1_68 = arith.constant 1 : index
    %c0_69 = arith.constant 0 : index
    %c0_70 = arith.constant 0 : index
    %102 = vector.load %arg6[%c1_68, %c0_69, %c0_70] : memref<3x1x128xf32, #tpu.memory_space<vmem>>, vector<1x1x128xf32>
    %103 = vector.shape_cast %102 : vector<1x1x128xf32> to vector<1x128xf32>
    %104 = arith.mulf %81, %103 : vector<1x128xf32>
    %cst_71 = arith.constant dense<0.000000e+00> : vector<1xf32>
    %105 = vector.multi_reduction <add>, %104, %cst_71 [1] : vector<1x128xf32> to vector<1xf32>
    %106 = vector.shape_cast %105 : vector<1xf32> to vector<1x1xf32>
    %c1_72 = arith.constant 1 : index
    %c0_73 = arith.constant 0 : index
    %c0_74 = arith.constant 0 : index
    %107 = vector.load %arg7[%c1_72, %c0_73, %c0_74] : memref<3x1x1xf32, #tpu.memory_space<vmem>>, vector<1x1x1xf32>
    %108 = vector.shape_cast %107 : vector<1x1x1xf32> to vector<1x1xf32>
    %109 = arith.addf %106, %108 : vector<1x1xf32>
    %110 = arith.negf %109 : vector<1x1xf32>
    %111 = math.exp %110 : vector<1x1xf32>
    %cst_75 = arith.constant 1.000000e+00 : f32
    %112 = vector.broadcast %cst_75 : f32 to vector<1x1xf32>
    %113 = arith.addf %112, %111 : vector<1x1xf32>
    %114 = arith.divf %112, %113 : vector<1x1xf32>
    %c0_76 = arith.constant 0 : index
    %c1_77 = arith.constant 1 : index
    %c0_78 = arith.constant 0 : index
    %c0_79 = arith.constant 0 : index
    %115 = vector.load %arg1[%c0_76, %c1_77, %c0_78, %c0_79] : memref<1x3x4x512xf32, #tpu.memory_space<vmem>>, vector<1x1x4x512xf32>
    %116 = vector.shape_cast %115 : vector<1x1x4x512xf32> to vector<4x512xf32>
    %117 = vector.broadcast %114 : vector<1x1xf32> to vector<4x512xf32>
    %118 = arith.mulf %117, %116 : vector<4x512xf32>
    %c0_80 = arith.constant 0 : index
    %c0_81 = arith.constant 0 : index
    %c0_82 = arith.constant 0 : index
    %119 = vector.load %arg8[%c0_80, %c0_81, %c0_82] : memref<1x4x512xf32, #tpu.memory_space<vmem>>, vector<1x4x512xf32>
    %120 = vector.shape_cast %119 : vector<1x4x512xf32> to vector<4x512xf32>
    %121 = arith.addf %120, %118 : vector<4x512xf32>
    %c0_83 = arith.constant 0 : index
    %c0_84 = arith.constant 0 : index
    %c0_85 = arith.constant 0 : index
    %122 = vector.load %arg8[%c0_83, %c0_84, %c0_85] : memref<1x4x512xf32, #tpu.memory_space<vmem>>, vector<1x4x512xf32>
    %123 = vector.shape_cast %122 : vector<1x4x512xf32> to vector<4x512xf32>
    %124 = vector.shape_cast %121 : vector<4x512xf32> to vector<1x4x512xf32>
    tpu.vector_store %arg8[%c0_83, %c0_84, %c0_85], %124 {strides = array<i32>} : memref<1x4x512xf32, #tpu.memory_space<vmem>>, vector<1x4x512xf32>,
    %c2_86 = arith.constant 2 : index
    %c0_87 = arith.constant 0 : index
    %c0_88 = arith.constant 0 : index
    %125 = vector.load %arg6[%c2_86, %c0_87, %c0_88] : memref<3x1x128xf32, #tpu.memory_space<vmem>>, vector<1x1x128xf32>
    %126 = vector.shape_cast %125 : vector<1x1x128xf32> to vector<1x128xf32>
    %127 = arith.mulf %81, %126 : vector<1x128xf32>
    %cst_89 = arith.constant dense<0.000000e+00> : vector<1xf32>
    %128 = vector.multi_reduction <add>, %127, %cst_89 [1] : vector<1x128xf32> to vector<1xf32>
    %129 = vector.shape_cast %128 : vector<1xf32> to vector<1x1xf32>
    %c2_90 = arith.constant 2 : index
    %c0_91 = arith.constant 0 : index
    %c0_92 = arith.constant 0 : index
    %130 = vector.load %arg7[%c2_90, %c0_91, %c0_92] : memref<3x1x1xf32, #tpu.memory_space<vmem>>, vector<1x1x1xf32>
    %131 = vector.shape_cast %130 : vector<1x1x1xf32> to vector<1x1xf32>
    %132 = arith.addf %129, %131 : vector<1x1xf32>
    %133 = arith.negf %132 : vector<1x1xf32>
    %134 = math.exp %133 : vector<1x1xf32>
    %cst_93 = arith.constant 1.000000e+00 : f32
    %135 = vector.broadcast %cst_93 : f32 to vector<1x1xf32>
    %136 = arith.addf %135, %134 : vector<1x1xf32>
    %137 = arith.divf %135, %136 : vector<1x1xf32>
    %c0_94 = arith.constant 0 : index
    %c2_95 = arith.constant 2 : index
    %c0_96 = arith.constant 0 : index
    %c0_97 = arith.constant 0 : index
    %138 = vector.load %arg1[%c0_94, %c2_95, %c0_96, %c0_97] : memref<1x3x4x512xf32, #tpu.memory_space<vmem>>, vector<1x1x4x512xf32>
    %139 = vector.shape_cast %138 : vector<1x1x4x512xf32> to vector<4x512xf32>
    %140 = vector.broadcast %137 : vector<1x1xf32> to vector<4x512xf32>
    %141 = arith.mulf %140, %139 : vector<4x512xf32>
    %c0_98 = arith.constant 0 : index
    %c0_99 = arith.constant 0 : index
    %c0_100 = arith.constant 0 : index
    %142 = vector.load %arg8[%c0_98, %c0_99, %c0_100] : memref<1x4x512xf32, #tpu.memory_space<vmem>>, vector<1x4x512xf32>
    %143 = vector.shape_cast %142 : vector<1x4x512xf32> to vector<4x512xf32>
    %144 = arith.addf %143, %141 : vector<4x512xf32>
    %c0_101 = arith.constant 0 : index
    %c0_102 = arith.constant 0 : index
    %c0_103 = arith.constant 0 : index
    %145 = vector.load %arg8[%c0_101, %c0_102, %c0_103] : memref<1x4x512xf32, #tpu.memory_space<vmem>>, vector<1x4x512xf32>
    %146 = vector.shape_cast %145 : vector<1x4x512xf32> to vector<4x512xf32>
    %147 = vector.shape_cast %144 : vector<4x512xf32> to vector<1x4x512xf32>
    tpu.vector_store %arg8[%c0_101, %c0_102, %c0_103], %147 {strides = array<i32>} : memref<1x4x512xf32, #tpu.memory_space<vmem>>, vector<1x4x512xf32>,
    return
  }
  func.func @transform_0(%arg0: i32) -> (i32, i32, i32, i32) {
    %c0_i32 = arith.constant 0 : i32
    %c0_i32_0 = arith.constant 0 : i32
    %c0_i32_1 = arith.constant 0 : i32
    %c0_i32_2 = arith.constant 0 : i32
    return %arg0, %c0_i32, %c0_i32_0, %c0_i32_1 : i32, i32, i32, i32
  }
  func.func @transform_1(%arg0: i32) -> (i32, i32, i32, i32) {
    %c0_i32 = arith.constant 0 : i32
    %c0_i32_0 = arith.constant 0 : i32
    %c0_i32_1 = arith.constant 0 : i32
    %c0_i32_2 = arith.constant 0 : i32
    return %arg0, %c0_i32, %c0_i32_0, %c0_i32_1 : i32, i32, i32, i32
  }
  func.func @transform_2(%arg0: i32) -> (i32, i32, i32) {
    %c0_i32 = arith.constant 0 : i32
    %c0_i32_0 = arith.constant 0 : i32
    %c0_i32_1 = arith.constant 0 : i32
    %c0_i32_2 = arith.constant 0 : i32
    return %c0_i32, %c0_i32_0, %c0_i32_1 : i32, i32, i32
  }
  func.func @transform_3(%arg0: i32) -> (i32, i32) {
    %c0_i32 = arith.constant 0 : i32
    %c0_i32_0 = arith.constant 0 : i32
    %c0_i32_1 = arith.constant 0 : i32
    return %c0_i32, %c0_i32_0 : i32, i32
  }
  func.func @transform_4(%arg0: i32) -> (i32, i32) {
    %c0_i32 = arith.constant 0 : i32
    %c0_i32_0 = arith.constant 0 : i32
    %c0_i32_1 = arith.constant 0 : i32
    return %c0_i32, %c0_i32_0 : i32, i32
  }
  func.func @transform_5(%arg0: i32) -> (i32, i32, i32) {
    %c0_i32 = arith.constant 0 : i32
    %c0_i32_0 = arith.constant 0 : i32
    %c0_i32_1 = arith.constant 0 : i32
    %c0_i32_2 = arith.constant 0 : i32
    return %c0_i32, %c0_i32_0, %c0_i32_1 : i32, i32, i32
  }
  func.func @transform_6(%arg0: i32) -> (i32, i32, i32) {
    %c0_i32 = arith.constant 0 : i32
    %c0_i32_0 = arith.constant 0 : i32
    %c0_i32_1 = arith.constant 0 : i32
    %c0_i32_2 = arith.constant 0 : i32
    return %c0_i32, %c0_i32_0, %c0_i32_1 : i32, i32, i32
  }
  func.func @transform_7(%arg0: i32) -> (i32, i32, i32) {
    %c0_i32 = arith.constant 0 : i32
    %c0_i32_0 = arith.constant 0 : i32
    %c0_i32_1 = arith.constant 0 : i32
    return %arg0, %c0_i32, %c0_i32_0 : i32, i32, i32
  }
}

</mosaic_0001>

<bundles_post_ra>
// kernel: tpu_custom_call.1
= control target key start
LH: loop header
LB: loop body
LE: loop exit
PB: predicated region body
PF: predicated region fallthrough
CT: control target
= control target key end

     0   :  { %s1815_s0 = inlined_call_operand.hbm [shape: f32[2,3,4,512], index: 0, kind: input, shape index: {}]   ;;  %s1816_s1 = inlined_call_operand.hbm [shape: f32[2,3,1,512], index: 1, kind: input, shape index: {}]   ;;  %s1817_s2 = inlined_call_operand.hbm [shape: f32[3,4,128], index: 2, kind: input, shape index: {}]   ;;  %s1818_s3 = inlined_call_operand.hbm [shape: f32[1,128], index: 3, kind: input, shape index: {}]   ;;  %s1819_s4 = inlined_call_operand.hbm [shape: f32[1,128], index: 4, kind: input, shape index: {}]   ;;  %s1820_s5 = inlined_call_operand.hbm [shape: f32[3,1,128], index: 5, kind: input, shape index: {}]   ;;  %s1821_s6 = inlined_call_operand.hbm [shape: f32[3,1,1], index: 6, kind: input, shape index: {}]   ;;  %s1822_s7 = inlined_call_operand.hbm [shape: f32[2,4,512], index: 7, kind: output, shape index: {}]  }
   0x1   :  { %1829 = sst [smem:[#allocation21_spill]] %s1815_s0 }
   0x2   :  { %1830 = sst [smem:[#allocation22_spill]] %s1817_s2 }
   0x3   :  { %1831 = sst [smem:[#allocation23_spill]] %s1818_s3 }
   0x4   :  { %1832 = sst [smem:[#allocation24_spill]] %s1819_s4 }
   0x5   :  { %1833 = sst [smem:[#allocation25_spill]] %s1820_s5 }
   0x6   :  { %12 = vsyncpa [#allocation3], 0 }
   0x7   :  { %14 = vsyncpa [#allocation3 + $0x1], 0 }
   0x8   :  { %15 = vsyncpa [#allocation6], 0 }
   0x9   :  { %17 = vsyncpa [#allocation6 + $0x1], 0 }
   0xa   :  { %18 = vsyncpa [#allocation9], 0 }
   0xb   :  { %19 = vsyncpa [#allocation12], 0 }
   0xc   :  { %20 = vsyncpa [#allocation4], 0 }
   0xd   :  { %22 = vsyncpa [#allocation4 + $0x1], 0  ;;  %s1371_s24 = smov 0   ;;  %s1373_s25 = smov 0  }
   0xe   :  { %s1375_s26 = smov 0   ;;  %s1377_s27 = smov 0  }
   0xf LB: > { %s1318_s28 = smov [#allocation7]   ;;  %s1392_s30 = sadd.s32 4294967295, %s1316_s27   ;;  %s1316_s27 = sphi %s1377_s27, %s1864_s27   ;;  %s1312_s26 = sphi %s1375_s26, %s1863_s26   ;;  %s1308_s25 = sphi %s1373_s25, %s1862_s25   ;;  %s1304_s24 = sphi %s1371_s24, %s1861_s24  }
  0x10   : > { %s228_s29 = sshll.u32 %s1318_s28, 4  ;;  %p856_p0 = scmp.ge.s32.totalorder %s1316_s27, 1  ;;  %s1397_s29 = int_to_ptr.vmem [resolvable:$true] %s228_s29 }
  0x11   : > { %p1825_p1 = scmp.eq.s32.totalorder %s1392_s30, 0  ;;  %p216_p2 = scmp.lt.s32.totalorder %s1316_s27, 3 }
  0x12   : > { %s1319_s9 = smov [#allocation8]   ;;  %s1320_s12 = smov [#allocation11]  }
  0x13   : > { %p1399_p3 = pnand %p856_p0, %p216_p2  ;;  %s242_s10 = sshll.u32 %s1319_s9, 4  ;;  %s1412_s10 = int_to_ptr.vmem [resolvable:$true] %s242_s10 }
  0x14   : > { %s263_s13 = sshll.u32 %s1320_s12, 4  ;;  %s1836_s2 = sld [smem:[#allocation22_spill]]  ;;  %s1414_s13 = int_to_ptr.vmem [resolvable:$true] %s263_s13 }
  0x15   : > { %s1834_s8 = scalar_select %p1399_p3, 1, 0 }
  0x16   : > { %p929_p5 = pneg %p1399_p3 }
  0x18   : > { %p1408_p6 = pnand %p929_p5, %p1825_p1 }
  0x1a   : > { %s1034_s16 = scalar_lea.hbm %s1836_s2, 192  ;;  %p1424_p8 = pneg %p1408_p6 }
  0x1b   : > { %p1035_p7 = scmp.ne.s32.totalorder %s1836_s2, %s1034_s16  ;;  %p1041_p11 = scmp.lt.u32.totalorder %s1034_s16, %s1836_s2 }
  0x1d   : > { %p1037_p9 = pnand %p1424_p8, %p1035_p7 }
  0x1f   : > { %p1038_p10 = pneg %p1037_p9 }
  0x21   : > { %p1043_p12 = pnand %p1041_p11, %p1038_p10 }
  0x23   : > { %1046 = shalt.err (!%p1043_p12)
}
  0x24   : > { %s1047_s22 = scalar_lea.vmem %s1397_s29, 192  ;;  %p1055_p5 = scmp.lt.s32.totalorder %s1397_s29, %s1397_s29 }
  0x25   : > { %p1048_p13 = scmp.ne.s32.totalorder %s1397_s29, %s1047_s22  ;;  %p1056_p4 = scmp.lt.s32.totalorder %s1047_s22, %s1047_s22 }
  0x27   : > { %p1050_p0 = pnand %p1048_p13, %p1424_p8  ;;  %p1057_p7 = por %p1056_p4, %p1055_p5 }
  0x29   : > { %p1051_p2 = pneg %p1050_p0 }
  0x2b   : > { %p1058_p9 = pnand %p1057_p7, %p1051_p2 }
  0x2d   : > { %1061 = shalt.err (!%p1058_p9)
}
  0x2e   : > { %s1823_s23 = smov 64   ;;  %s1824_s28 = smov 4  }
  0x2f   : > { %932 = dma.hbm_to_vmem [thread:$0]  (!%p1408_p6), %s1836_s2, 192, %s1397_s29, [#allocation6], %s1823_s23, %s1823_s23, %s1824_s28  }
  0x30   : > { %s1838_s3 = sld [smem:[#allocation23_spill]] }
  0x36   : > { %s1062_s16 = scalar_lea.hbm %s1838_s3, 16 }
  0x37   : > { %p1063_p4 = scmp.ne.s32.totalorder %s1838_s3, %s1062_s16  ;;  %p1069_p12 = scmp.lt.u32.totalorder %s1062_s16, %s1838_s3 }
  0x39   : > { %p1065_p10 = pnand %p1063_p4, %p1424_p8 }
  0x3b   : > { %p1066_p11 = pneg %p1065_p10 }
  0x3d   : > { %p1071_p13 = pnand %p1069_p12, %p1066_p11 }
  0x3f   : > { %1074 = shalt.err (!%p1071_p13)
}
  0x40   : > { %s1075_s29 = scalar_lea.vmem %s1412_s10, 16  ;;  %s1082_s22 = scalar_lea.vmem %s1412_s10, 32 }
  0x41   : > { %p1076_p0 = scmp.ne.s32.totalorder %s1412_s10, %s1075_s29  ;;  %p1083_p7 = scmp.lt.s32.totalorder %s1412_s10, %s1412_s10 }
  0x42   : > { %p1084_p9 = scmp.lt.s32.totalorder %s1082_s22, %s1075_s29 }
  0x43   : > { %p1078_p2 = pnand %p1076_p0, %p1424_p8 }
  0x44   : > { %p1085_p4 = por %p1084_p9, %p1083_p7 }
  0x45   : > { %p1079_p5 = pneg %p1078_p2 }
  0x47   : > { %p1086_p10 = pnand %p1085_p4, %p1079_p5 }
  0x49   : > { %1089 = shalt.err (!%p1086_p10)
}
  0x4a   : > { %935 = dma.hbm_to_vmem [thread:$0]  (!%p1408_p6), %s1838_s3, 16, %s1412_s10, [#allocation9]  }
  0x4b   : > { %s1839_s5 = sld [smem:[#allocation25_spill]] }
  0x51   : > { %s1090_s16 = scalar_lea.hbm %s1839_s5, 48 }
  0x52   : > { %p1091_p11 = scmp.ne.s32.totalorder %s1839_s5, %s1090_s16  ;;  %p1097_p0 = scmp.lt.u32.totalorder %s1090_s16, %s1839_s5 }
  0x54   : > { %p1093_p12 = pnand %p1091_p11, %p1424_p8 }
  0x56   : > { %p1094_p13 = pneg %p1093_p12 }
  0x58   : > { %p1099_p2 = pnand %p1097_p0, %p1094_p13 }
  0x5a   : > { %1102 = shalt.err (!%p1099_p2)
}
  0x5b   : > { %s1103_s10 = scalar_lea.vmem %s1414_s13, 48  ;;  %s1110_s29 = scalar_lea.vmem %s1414_s13, 64 }
  0x5c   : > { %p1104_p5 = scmp.ne.s32.totalorder %s1414_s13, %s1103_s10  ;;  %p1111_p4 = scmp.lt.s32.totalorder %s1414_s13, %s1414_s13 }
  0x5d   : > { %p1112_p10 = scmp.lt.s32.totalorder %s1110_s29, %s1103_s10 }
  0x5e   : > { %p1106_p7 = pnand %p1104_p5, %p1424_p8 }
  0x5f   : > { %p1113_p11 = por %p1112_p10, %p1111_p4 }
  0x60   : > { %p1107_p9 = pneg %p1106_p7 }
  0x62   : > { %p1114_p12 = pnand %p1113_p11, %p1107_p9 }
  0x64   : > { %1117 = shalt.err (!%p1114_p12)
}
  0x65   : > { %s1827_s22 = smov 16   ;;  %s1324_s9 = smov 1  }
  0x66   : > { %941 = dma.hbm_to_vmem [thread:$0]  (!%p1408_p6), %s1839_s5, 48, %s1414_s13, [#allocation12], %s1827_s22, %s1827_s22, %s1324_s9  }
  0x67   : > { %s1325_s15 = smov [#allocation10]   ;;  %s1326_s17 = smov [#allocation13]  }
  0x68   : > { %s253_s16 = sshll.u32 %s1325_s15, 4  ;;  %s276_s18 = sshll.u32 %s1326_s17, 4  ;;  %s254_s16 = int_to_ptr.vmem [resolvable:$true] %s253_s16  ;;  %s277_s18 = int_to_ptr.vmem [resolvable:$true] %s276_s18 }
  0x69   : > { %s1840_s4 = sld [smem:[#allocation24_spill]] }
  0x6f   : > { %s1118_s10 = scalar_lea.hbm %s1840_s4, 16 }
  0x70   : > { %p1119_p13 = scmp.ne.s32.totalorder %s1840_s4, %s1118_s10  ;;  %p1125_p5 = scmp.lt.u32.totalorder %s1118_s10, %s1840_s4 }
  0x72   : > { %p1121_p0 = pnand %p1119_p13, %p1424_p8 }
  0x74   : > { %p1122_p2 = pneg %p1121_p0 }
  0x76   : > { %p1127_p7 = pnand %p1125_p5, %p1122_p2 }
  0x78   : > { %1130 = shalt.err (!%p1127_p7)
}
  0x79   : > { %s1131_s13 = scalar_lea.vmem %s254_s16, 16  ;;  %s1138_s12 = scalar_lea.vmem %s254_s16, 32 }
  0x7a   : > { %p1132_p9 = scmp.ne.s32.totalorder %s254_s16, %s1131_s13  ;;  %p1139_p11 = scmp.lt.s32.totalorder %s254_s16, %s254_s16 }
  0x7b   : > { %p1140_p12 = scmp.lt.s32.totalorder %s1138_s12, %s1131_s13 }
  0x7c   : > { %p1134_p4 = pnand %p1132_p9, %p1424_p8 }
  0x7d   : > { %p1141_p1 = por %p1140_p12, %p1139_p11 }
  0x7e   : > { %p1135_p10 = pneg %p1134_p4 }
  0x80   : > { %p1142_p3 = pnand %p1141_p1, %p1135_p10 }
  0x82   : > { %1145 = shalt.err (!%p1142_p3)
}
  0x83   : > { %938 = dma.hbm_to_vmem [thread:$0]  (!%p1408_p6), %s1840_s4, 16, %s254_s16, [#allocation9]  }
  0x84   : > { %s1146_s15 = scalar_lea.hbm %s1821_s6, 48 }
  0x85   : > { %p1147_p13 = scmp.ne.s32.totalorder %s1821_s6, %s1146_s15  ;;  %p1153_p3 = scmp.lt.u32.totalorder %s1146_s15, %s1821_s6 }
  0x87   : > { %p1149_p0 = pnand %p1147_p13, %p1424_p8 }
  0x89   : > { %p1150_p1 = pneg %p1149_p0 }
  0x8b   : > { %p1155_p2 = pnand %p1153_p3, %p1150_p1 }
  0x8d   : > { %1158 = shalt.err (!%p1155_p2)
}
  0x8e   : > { %s1159_s29 = scalar_lea.vmem %s277_s18, 48  ;;  %s1166_s16 = scalar_lea.vmem %s277_s18, 64 }
  0x8f   : > { %p1160_p5 = scmp.ne.s32.totalorder %s277_s18, %s1159_s29  ;;  %p1167_p4 = scmp.lt.s32.totalorder %s277_s18, %s277_s18 }
  0x90   : > { %p1168_p10 = scmp.lt.s32.totalorder %s1166_s16, %s1159_s29 }
  0x91   : > { %p1162_p7 = pnand %p1160_p5, %p1424_p8 }
  0x92   : > { %p1169_p11 = por %p1168_p10, %p1167_p4 }
  0x93   : > { %p1163_p9 = pneg %p1162_p7 }
  0x95   : > { %p1170_p12 = pnand %p1169_p11, %p1163_p9 }
  0x97   : > { %1173 = shalt.err (!%p1170_p12)
}
  0x98   : > { %944 = dma.hbm_to_vmem [thread:$0]  (!%p1408_p6), %s1821_s6, 48, %s277_s18, [#allocation12], %s1827_s22, %s1827_s22, %s1324_s9  }
  0x99   : > { %s855_s11 = sadd.s32 4294967294, %s1316_s27   ;;  %s1540_s19 = sadd.s32 1, %s1316_s27  }
  0x9a   : > { %s35_s23 = sadd.s32 1, %s1312_s26  ;;  %s32_s14 = ssub.s32 %s1316_s27, %s1540_s19 }
  0x9b   : > { %p42_p8 = scmp.ne.s32.totalorder %s1312_s26, %s1308_s25  ;;  %p33_p13 = scmp.eq.s32.totalorder %s32_s14, 0 }
  0x9c   : > { %p43_p0 = scmp.eq.s32.totalorder %s1316_s27, 0  ;;  %p48_p1 = scmp.ne.s32.totalorder %s1308_s25, %s1304_s24 }
  0x9d   : > { %p203_p3 = scmp.eq.s32.totalorder %s1392_s30, 1  ;;  %p1841_p5 = scmp.eq.s32.totalorder %s1392_s30, 0 }
  0x9e   : > { %s1552_s2 = scalar_select %p33_p13, %s1312_s26, %s35_s23  }
  0x9f   : > { %p44_p2 = por %p43_p0, %p42_p8  ;;  %p1556_p7 = por %p1841_p5, %p48_p1 }
  0xa0   : > { %p1560_p6 = por %p203_p3, %p42_p8  ;;  %p209_p9 = scmp.eq.s32.totalorder %s855_s11, 1 }
  0xa1   : > { %p961_p4 = scmp.lt.s32.totalorder %s1316_s27, 2  ;;  %s1566_s28 = sand.u32 1, %s1312_s26  }
  0xa2   : > { %s1843_s18 = scalar_select %p1560_p6, 1, 0 }
  0xa3   : > { %p1568_p10 = por %p209_p9, %p48_p1  ;;  %s891_s17 = smul.u32 48, %s1566_s28 }
  0xa4   : > { %p1573_p11 = pnand %p961_p4, %p44_p2  ;;  %s892_s21 = smul.u32 768, %s1316_s27 }
  0xa5   : > { %s1844_s15 = scalar_select %p1568_p10, 1, 0 }
  0xa6   : > { %s1846_s0 = sld [smem:[#allocation21_spill]]  ;;  %s294_s13 = scalar_lea.vmem [#allocation2], %s891_s17 }
  0xa7   : > { %s301_s12 = sshll.u32 %s294_s13, 4  ;;  %s291_s23 = scalar_lea.sflag [#allocation3], %s1566_s28  ;;  %s1583_s12 = int_to_ptr.vmem [resolvable:$true] %s301_s12 }
  0xa8   : > { %p1176_p8 = pneg %p1573_p11 }
  0xac   : > { %s1581_s16 = scalar_lea.hbm %s1846_s0, %s892_s21  ;;  %s1179_s29 = scalar_lea.hbm %s1846_s0, 1536 }
  0xad   : > { %s1174_s14 = scalar_lea.hbm %s1581_s16, 768  ;;  %p1180_p1 = scmp.lt.u32.totalorder %s1581_s16, %s1846_s0 }
  0xae   : > { %p1175_p12 = scmp.ne.s32.totalorder %s1581_s16, %s1174_s14  ;;  %p1181_p3 = scmp.lt.u32.totalorder %s1179_s29, %s1174_s14 }
  0xaf   : > { %p1183_p5 = scmp.lt.u32.totalorder %s1174_s14, %s1581_s16 }
  0xb0   : > { %p1177_p13 = pnand %p1176_p8, %p1175_p12  ;;  %p1182_p2 = por %p1181_p3, %p1180_p1 }
  0xb2   : > { %p1178_p0 = pneg %p1177_p13  ;;  %p1184_p9 = por %p1183_p5, %p1182_p2 }
  0xb4   : > { %p1185_p4 = pnand %p1184_p9, %p1178_p0 }
  0xb6   : > { %1188 = shalt.err (!%p1185_p4)
}
  0xb7   : > { %s1189_s17 = scalar_lea.vmem %s1583_s12, 768  ;;  %s1327_s13 = smov [#allocation2]  }
  0xb8   : > { %p1190_p12 = scmp.ne.s32.totalorder %s1583_s12, %s1189_s17  ;;  %s1194_s21 = sshll.u32 %s1327_s13, 4  ;;  %s1195_s21 = int_to_ptr.vmem [resolvable:$false] %s1194_s21 }
  0xb9   : > { %s1196_s3 = scalar_lea.vmem %s1195_s21, 1536  ;;  %p1197_p6 = scmp.lt.s32.totalorder %s1583_s12, %s1195_s21 }
  0xba   : > { %p1192_p13 = pnand %p1190_p12, %p1176_p8  ;;  %p1198_p1 = scmp.lt.s32.totalorder %s1196_s3, %s1189_s17 }
  0xbc   : > { %p1193_p10 = pneg %p1192_p13  ;;  %p1199_p3 = por %p1198_p1, %p1197_p6 }
  0xbe   : > { %p1200_p2 = pnand %p1199_p3, %p1193_p10 }
  0xc0   : > { %1203 = shalt.err (!%p1200_p2)
}
  0xc1   : > { %s1328_s22 = smov 256   ;;  %s1847_s14 = smov 16  }
  0xc2   : > { %948 = dma.hbm_to_vmem [thread:$0]  (!%p1573_p11), %s1581_s16, 768, %s1583_s12, %s291_s23, %s1328_s22, %s1328_s22, %s1847_s14  }
  0xc3   : > { %s893_s10 = smul.u32 12, %s1566_s28  ;;  %s1848_s0 = sand.u32 1, %s1316_s27  }
  0xc4   : > { %s894_s29 = smul.u32 192, %s1316_s27  ;;  %s1626_s4 = scalar_lea.sflag [#allocation6], %s1848_s0 }
  0xc5   : > { %s315_s3 = scalar_lea.vmem [#allocation5], %s893_s10  ;;  %s1209_s12 = scalar_lea.hbm %s1816_s1, 384 }
  0xc6   : > { %s1620_s21 = scalar_lea.hbm %s1816_s1, %s894_s29  ;;  %s322_s11 = sshll.u32 %s315_s3, 4  ;;  %s1622_s11 = int_to_ptr.vmem [resolvable:$true] %s322_s11 }
  0xc7   : > { %s1204_s5 = scalar_lea.hbm %s1620_s21, 192  ;;  %p1210_p5 = scmp.lt.u32.totalorder %s1620_s21, %s1816_s1 }
  0xc8   : > { %p1205_p6 = scmp.ne.s32.totalorder %s1620_s21, %s1204_s5  ;;  %p1211_p9 = scmp.lt.u32.totalorder %s1209_s12, %s1204_s5 }
  0xc9   : > { %p1213_p12 = scmp.lt.u32.totalorder %s1204_s5, %s1620_s21 }
  0xca   : > { %p1207_p10 = pnand %p1205_p6, %p1176_p8  ;;  %p1212_p4 = por %p1211_p9, %p1210_p5 }
  0xcc   : > { %p1208_p0 = pneg %p1207_p10  ;;  %p1214_p13 = por %p1213_p12, %p1212_p4 }
  0xce   : > { %p1215_p1 = pnand %p1214_p13, %p1208_p0 }
  0xd0   : > { %1218 = shalt.err (!%p1215_p1)
}
  0xd1   : > { %s1219_s0 = scalar_lea.vmem %s1622_s11, 192  ;;  %s1329_s14 = smov [#allocation5]  }
  0xd2   : > { %p1220_p3 = scmp.ne.s32.totalorder %s1622_s11, %s1219_s0  ;;  %s1224_s10 = sshll.u32 %s1329_s14, 4  ;;  %s1225_s10 = int_to_ptr.vmem [resolvable:$false] %s1224_s10 }
  0xd3   : > { %s1226_s29 = scalar_lea.vmem %s1225_s10, 384  ;;  %p1227_p10 = scmp.lt.s32.totalorder %s1622_s11, %s1225_s10 }
  0xd4   : > { %p1222_p2 = pnand %p1220_p3, %p1176_p8  ;;  %p1228_p5 = scmp.lt.s32.totalorder %s1226_s29, %s1219_s0 }
  0xd6   : > { %p1223_p6 = pneg %p1222_p2  ;;  %p1229_p9 = por %p1228_p5, %p1227_p10 }
  0xd8   : > { %p1230_p4 = pnand %p1229_p9, %p1223_p6 }
  0xda   : > { %1233 = shalt.err (!%p1230_p4)
}
  0xdb   : > { %s1849_s5 = smov 4   ;;  %s1850_s13 = smov 64  }
  0xdc   : > { %951 = dma.hbm_to_vmem [thread:$0]  (!%p1573_p11), %s1620_s21, 192, %s1622_s11, %s1626_s4, %s1850_s13, %s1850_s13, %s1849_s5  }
  0xdd   : > { %p1851_p8 = scmp.ne.s32.totalorder %s1834_s8, 0 }
  0xde   : > { %s1658_s17 = sand.u32 (!%p1851_p8), 1, %s1308_s25  }
  0xdf   : > { %334 = sbr.rel (%p1851_p8) target bundleno = 694 (0x2b6), region = 48  ;;  %s337_s28 = scalar_lea.sflag (!%p1851_p8), [#allocation3], %s1658_s17 }
  0xe0   : > { %s895_s3 = smul.u32 (!%p1851_p8), 48, %s1658_s17 }
  0xe2   : > { %s1662_s16 = scalar_lea.vmem (!%p1851_p8), [#allocation2], %s895_s3 }
  0xe6   : > { %1279 = dma.done.wait (%p1556_p7), %s337_s28, 768  }
  0xe7   : > { %1281 = vsyncadd (%p1556_p7), %s337_s28, 4294966528  ;;  %s345_s4 = sand.u32 1, %s1392_s30   ;;  %s896_s8 = smul.u32 12, %s1658_s17 }
  0xe8   : > { %s346_s20 = scalar_lea.sflag [#allocation6], %s345_s4 }
  0xe9   : > { %s349_s11 = scalar_lea.vmem [#allocation5], %s896_s8 }
  0xea   : > { %1283 = dma.done.wait (%p1556_p7), %s346_s20, 192  }
  0xeb   : > { %1285 = vsyncadd (%p1556_p7), %s346_s20, 4294967104  ;;  %p1852_p11 = scmp.eq.s32.totalorder %s1392_s30, 0 }
  0xed   : > { %1287 = dma.done.wait (%p1852_p11), [#allocation6], 192   ;;  %p1853_p0 = pmov %p1852_p11 }
  0xef   : > { %1289 = vsyncadd (%p1853_p0), [#allocation6], 4294967104  ;;  %p1854_p12 = pmov %p1853_p0 }
  0xf0   : > { %p1855_p13 = pmov %p1853_p0 }
  0xf1   : > { %1291 = dma.done.wait (%p1854_p12), [#allocation9], 32  }
  0xf2   : > { %1293 = vsyncadd (%p1855_p13), [#allocation9], 4294967264  ;;  %p1856_p1 = pmov %p1853_p0 }
  0xf3   : > { %p1857_p3 = pmov %p1853_p0 }
  0xf4   : > { %1295 = dma.done.wait (%p1856_p1), [#allocation12], 96  }
  0xf5   : > { %1297 = vsyncadd (%p1857_p3), [#allocation12], 4294967200  ;;  %v407_v0 = vlaneseq  ;;  %vm427_vm0 = vcmask 1040384   ;;  %v875_v6 = vld [vmem:[%s349_s11 + $0x8] sm:$0xf]  ;;  %vm447_vm1 = vcmask 1043456  }
  0xf6   : > { %v405_v7 = vld [vmem:[%s349_s11] sm:$0xf]  ;;  %v872_v16 = vld [vmem:[%s349_s11 + $0x4] sm:$0xf]  ;;  %v1701_v26 = vld [vmem:[%s1662_s16 + $0x8] sm:$0xff]  ;;  %s871_s9 = sshll.u32 %s1658_s17, 4 }
  0xf7   : > { %v408_v1 = vshrl.u32 %v407_v0, 7  ;;  %v1695_v21 = vld [vmem:[%s1662_s16] sm:$0xff]  ;;  %v444_v38 = vcombine.high %v1701_v26, %v1701_v26  ;;  %v1717_v44 = vld [vmem:[%s1662_s16 + $0x28] sm:$0xff]  ;;  %v1720_v45 = vld [vmem:[%s1662_s16 + $0x10] sm:$0xff]  ;;  %v451_v49 = vsel %vm447_vm1, %v1701_v26, 0.0  ;;  %s890_s22 = sshll.u32 %s1392_s30, 8 }
  0xf8   : > { %v443_v34 = vcombine.high %v1695_v21, %v1695_v21  ;;  %v1712_v39 = vld [vmem:[%s1662_s16 + $0x20] sm:$0xff]  ;;  %v448_v47 = vsel %vm447_vm1, %v1695_v21, 0.0  ;;  %v1728_v50 = vld [vmem:[%s1662_s16 + $0x18] sm:$0xff]  ;;  %v563_v55 = vcombine.high %v1717_v44, %v1717_v44  ;;  %v569_v57 = vsel %vm447_vm1, %v1717_v44, 0.0  ;;  %s404_s0 = scalar_lea.vmem [#allocation14], %s871_s9  ;;  %s1771_s5 = scalar_lea.hbm %s1822_s7, %s890_s22 }
  0xf9   : > { %v1686_v2 = vsub.s32 0, %v408_v1  ;;  %v413_v3 = vsub.s32 1, %v408_v1  ;;  %v417_v4 = vsub.s32 2, %v408_v1  ;;  %v421_v5 = vsub.s32 3, %v408_v1  ;;  %s715_s14 = sshll.u32 %s404_s0, 4  ;;  %s701_s30 = scalar_lea.sflag [#allocation4], %s1658_s17  ;;  %s1773_s14 = int_to_ptr.vmem [resolvable:$true] %s715_s14 }
  0xfa   : > { %v449_v48 = vsel %vm447_vm1, %v443_v34, 0.0  ;;  %v453_v53 = vsel %vm447_vm1, %v444_v38, 0.0  ;;  %v562_v54 = vcombine.high %v1712_v39, %v1712_v39  ;;  %v566_v56 = vsel %vm447_vm1, %v1712_v39, 0.0  ;;  %s1234_s13 = scalar_lea.vmem %s1773_s14, 256  ;;  %p1858_p2 = scmp.ne.s32.totalorder %s1843_s18, 0 }
  0xfb   : > { %v529_v8 = vrot.slane %v875_v6, %v1686_v2  ;;  %v533_v9 = vrot.slane %v875_v6, %v413_v3  ;;  %v537_v10 = vrot.slane %v875_v6, %v417_v4  ;;  %v541_v11 = vrot.slane %v875_v6, %v421_v5  ;;  %p1235_p7 = scmp.ne.s32.totalorder %s1773_s14, %s1234_s13  ;;  %s1330_s3 = smov [#allocation14]  }
  0xfc   : > { %v410_v12 = vrot.slane %v405_v7, %v1686_v2  ;;  %v414_v13 = vrot.slane %v405_v7, %v413_v3  ;;  %v418_v14 = vrot.slane %v405_v7, %v417_v4  ;;  %v422_v15 = vrot.slane %v405_v7, %v421_v5  ;;  %s1238_s28 = sshll.u32 %s1330_s3, 4  ;;  %s1239_s28 = int_to_ptr.vmem [resolvable:$false] %s1238_s28 }
  0xfd   : > { %v546_v17 = vsel %vm427_vm0, %v529_v8, 0.0  ;;  %v547_v18 = vsel %vm427_vm0, %v533_v9, 0.0  ;;  %v549_v19 = vsel %vm427_vm0, %v537_v10, 0.0  ;;  %v551_v20 = vsel %vm427_vm0, %v541_v11, 0.0  ;;  %p1236_p6 = pnand %p1235_p7, %p1858_p2  ;;  %s1240_s16 = scalar_lea.vmem %s1239_s28, 512 }
  0xfe   : > { %v548_v22 = vadd.f32 %v547_v18, %v546_v17  ;;  %v428_v23 = vsel %vm427_vm0, %v410_v12, 0.0  ;;  %v429_v24 = vsel %vm427_vm0, %v414_v13, 0.0  ;;  %v431_v25 = vsel %vm427_vm0, %v418_v14, 0.0  ;;  %p1241_p5 = scmp.lt.s32.totalorder %s1773_s14, %s1239_s28  ;;  %p1242_p9 = scmp.lt.s32.totalorder %s1240_s16, %s1234_s13 }
  0xff   : > { %v430_v27 = vadd.f32 %v429_v24, %v428_v23  ;;  %v433_v28 = vsel %vm427_vm0, %v422_v15, 0.0  ;;  %v470_v29 = vrot.slane %v872_v16, %v1686_v2  ;;  %v474_v30 = vrot.slane %v872_v16, %v413_v3  ;;  %p1237_p10 = pneg %p1236_p6 }
 0x100   : > { %v550_v31 = vadd.f32 %v549_v19, %v548_v22  ;;  %v478_v32 = vrot.slane %v872_v16, %v417_v4  ;;  %v482_v33 = vrot.slane %v872_v16, %v421_v5  ;;  %v450_v52 = vadd.f32 %v449_v48, %v448_v47  ;;  %p1243_p4 = por %p1242_p9, %p1241_p5 }
 0x101   : > { %v432_v35 = vadd.f32 %v431_v25, %v430_v27  ;;  %v487_v36 = vsel %vm427_vm0, %v470_v29, 0.0  ;;  %v488_v37 = vsel %vm427_vm0, %v474_v30, 0.0  ;;  %v503_v58 = vcombine.high %v1720_v45, %v1720_v45 }
 0x102   : > { %v552_v40 = vadd.f32 %v551_v20, %v550_v31  ;;  %v489_v41 = vadd.f32 %v488_v37, %v487_v36  ;;  %v490_v42 = vsel %vm427_vm0, %v478_v32, 0.0  ;;  %v492_v43 = vsel %vm427_vm0, %v482_v33, 0.0  ;;  %v608_v32 = vld [vmem:[#allocation7 + $0x8] sm:$0xf]  ;;  %v586_v33 = vld [vmem:[#allocation7] sm:$0xf]  ;;  %p1244_p8 = pnand %p1243_p4, %p1237_p10 }
 0x103   : > { %v434_v46 = vadd.f32 %v433_v28, %v432_v35  ;;  %v452_v60 = vadd.f32 %v451_v49, %v450_v52  ;;  %v567_v61 = vsel %vm447_vm1, %v562_v54, 0.0  ;;  %v504_v62 = vcombine.high %v1728_v50, %v1728_v50 }
 0x104   : > { %553 = vadd.xlane.f32.xlu1 %v552_v40  ;;  %v491_v51 = vadd.f32 %v490_v42, %v489_v41  ;;  %v568_v63 = vadd.f32 %v567_v61, %v566_v56  ;;  %v507_v0 = vsel %vm447_vm1, %v1720_v45, 0.0  ;;  %v508_v1 = vsel %vm447_vm1, %v503_v58, 0.0  ;;  %v583_v58 = vld [vmem:[#allocation8] sm:$0x1] }
 0x105   : > { %435 = vadd.xlane.f32.xlu0 %v434_v46  ;;  %v454_v3 = vadd.f32 %v453_v53, %v452_v60  ;;  %v571_v4 = vsel %vm447_vm1, %v563_v55, 0.0  ;;  %v509_v5 = vadd.f32 %v508_v1, %v507_v0  ;;  %v510_v6 = vsel %vm447_vm1, %v1728_v50, 0.0  ;;  %v582_v0 = vld [vmem:[#allocation10] sm:$0x1] }
 0x106   : > { %v493_v59 = vadd.f32 %v492_v43, %v491_v51  ;;  %v570_v7 = vadd.f32 %v569_v57, %v568_v63  ;;  %v512_v8 = vsel %vm447_vm1, %v504_v62, 0.0  ;;  %v597_v43 = vld [vmem:[#allocation7 + $0x4] sm:$0xf] }
 0x107   : > { %v511_v9 = vadd.f32 %v510_v6, %v509_v5 }
 0x108   : > { %455 = vadd.xlane.f32.xlu1 %v454_v3  ;;  %v572_v10 = vadd.f32 %v571_v4, %v570_v7 }
 0x109   : > { %494 = vadd.xlane.f32.xlu0 %v493_v59  ;;  %v513_v11 = vadd.f32 %v512_v8, %v511_v9 }
 0x10c   : > { %573 = vadd.xlane.f32.xlu1 %v572_v10 }
 0x10d   : > { %514 = vadd.xlane.f32.xlu0 %v513_v11 }
 0x191   : > { %v554_v12 = vpop.xlane.xlu1 %553 }
 0x192   : > { %v555_v13 = vmul.f32 0.001953125, %v554_v12  ;;  %v436_v14 = vpop.xlane.xlu0 %435  ;;  %v643_v12 = vld [vmem:[#allocation11 + $0x1] sm:$0x1] }
 0x193   : > { %v437_v15 = vmul.f32 0.001953125, %v436_v14  ;;  %v621_v14 = vld [vmem:[#allocation11] sm:$0x1] }
 0x194   : > { %v556_v16 = vadd.f32 1e-07, %v555_v13 }
 0x195   : > { %v438_v17 = vadd.f32 1e-07, %v437_v15  ;;  %v456_v20 = vpop.xlane.xlu1 %455 }
 0x196   : > { %1016 = vrcp.f32 %v556_v16  ;;  %v495_v18 = vpop.xlane.xlu0 %494  ;;  %v457_v27 = vmul.f32 0.001953125, %v456_v20  ;;  %v672_v16 = vld [vmem:[#allocation11 + $0x2] sm:$0x1] }
 0x197   : > { %1018 = vrcp.f32 %v438_v17  ;;  %v496_v19 = vmul.f32 0.001953125, %v495_v18 }
 0x199   : > { %v497_v22 = vadd.f32 1e-07, %v496_v19  ;;  %v574_v23 = vpop.xlane.xlu1 %573 }
 0x19a   : > { %v575_v24 = vmul.f32 0.001953125, %v574_v23  ;;  %v515_v30 = vpop.xlane.xlu0 %514 }
 0x19b   : > { %1020 = vrcp.f32 %v497_v22  ;;  %v516_v36 = vmul.f32 0.001953125, %v515_v30 }
 0x1a0   : > { %v1017_v25 = vpop.eup %1016 }
 0x1a1   : > { %v1019_v28 = vpop.eup %1018  ;;  %v580_v29 = vrot.slane %v1017_v25, %v1686_v2  ;;  %v626_v25 = vld [vmem:[#allocation13] sm:$0x1] }
 0x1a2   : > { %v462_v31 = vrot.slane %v1019_v28, %v1686_v2 }
 0x1a3   : > { %v581_v34 = vmul.f32 %v580_v29, %v575_v24  ;;  %v649_v24 = vld [vmem:[#allocation13 + $0x1] sm:$0x1] }
 0x1a4   : > { %v463_v35 = vmul.f32 %v462_v31, %v457_v27  ;;  %v678_v31 = vld [vmem:[#allocation13 + $0x2] sm:$0x1] }
 0x1a5   : > { %v1021_v37 = vpop.eup %1020  ;;  %v609_v38 = vmul.f32 %v608_v32, %v581_v34 }
 0x1a6   : > { %v587_v40 = vmul.f32 %v586_v33, %v463_v35  ;;  %v521_v41 = vrot.slane %v1021_v37, %v1686_v2  ;;  %v584_v2 = vmul.f32 %v583_v58, %v438_v17 }
 0x1a7   : > { %v610_v42 = vsel %vm447_vm1, %v609_v38, 0.0 }
 0x1a8   : > { %v588_v46 = vsel %vm447_vm1, %v587_v40, 0.0  ;;  %v611_v47 = vrot.slane %v610_v42, 4  ;;  %v522_v48 = vmul.f32 %v521_v41, %v516_v36  ;;  %v585_v4 = vadd.f32 %v584_v2, %v582_v0 }
 0x1a9   : > { %v589_v49 = vrot.slane %v588_v46, 4 }
 0x1aa   : > { %v612_v51 = vadd.f32 %v611_v47, %v610_v42  ;;  %v598_v52 = vmul.f32 %v597_v43, %v522_v48 }
 0x1ab   : > { %v590_v53 = vadd.f32 %v589_v49, %v588_v46 }
 0x1ac   : > { %v599_v54 = vsel %vm447_vm1, %v598_v52, 0.0  ;;  %v613_v56 = vrot.slane %v612_v51, 2 }
 0x1ad   : > { %v591_v55 = vrot.slane %v590_v53, 2  ;;  %v600_v57 = vrot.slane %v599_v54, 4 }
 0x1ae   : > { %v614_v62 = vadd.f32 %v613_v56, %v612_v51 }
 0x1af   : > { %v592_v59 = vadd.f32 %v591_v55, %v590_v53  ;;  %v601_v60 = vadd.f32 %v600_v57, %v599_v54 }
 0x1b0   : > { %v615_v5 = vrot.slane %v614_v62, 1 }
 0x1b1   : > { %v593_v61 = vrot.slane %v592_v59, 1  ;;  %v602_v63 = vrot.slane %v601_v60, 2 }
 0x1b2   : > { %v616_v10 = vadd.f32 %v615_v5, %v614_v62 }
 0x1b3   : > { %v594_v1 = vadd.f32 %v593_v61, %v592_v59  ;;  %v603_v3 = vadd.f32 %v602_v63, %v601_v60 }
 0x1b5   : > { %v604_v6 = vrot.slane %v603_v3, 1  ;;  %v595_v8 = vadd.f32 %v594_v1, %v585_v4 }
 0x1b7   : > { %v605_v7 = vadd.f32 %v604_v6, %v603_v3 }
 0x1b9   : > { %v606_v9 = vadd.f32 %v605_v7, %v595_v8 }
 0x1bb   : > { %v617_v11 = vadd.f32 %v616_v10, %v606_v9 }
 0x1bd   : > { %vm618_vm2 = vcmp.gt.f32.partialorder %v617_v11, 0.0  ;;  %v619_v13 = vmul.f32 0.2, %v617_v11 }
 0x1bf   : > { %v620_v15 = vsel %vm618_vm2, %v617_v11, %v619_v13 }
 0x1c0   : > { %v644_v17 = vmul.f32 %v643_v12, %v620_v15  ;;  %v622_v18 = vmul.f32 %v621_v14, %v620_v15  ;;  %v673_v22 = vmul.f32 %v672_v16, %v620_v15 }
 0x1c2   : > { %v645_v19 = vsel %vm427_vm0, %v644_v17, 0.0  ;;  %v623_v20 = vsel %vm427_vm0, %v622_v18, 0.0  ;;  %v674_v23 = vsel %vm427_vm0, %v673_v22, 0.0 }
 0x1c3   : > { %646 = vadd.xlane.f32.xlu1 %v645_v19  ;;  %624 = vadd.xlane.f32.xlu0 %v623_v20 }
 0x1c7   : > { %675 = vadd.xlane.f32.xlu0 %v674_v23 }
 0x250   : > { %v647_v27 = vpop.xlane.xlu1 %646  ;;  %v625_v28 = vpop.xlane.xlu0 %624 }
 0x251   : > { %v650_v29 = vadd.f32 %v649_v24, %v647_v27  ;;  %v627_v30 = vadd.f32 %v626_v25, %v625_v28 }
 0x253   : > { %v879_v32 = vmul.f32 -1.442695, %v650_v29  ;;  %v878_v33 = vmul.f32 -1.442695, %v627_v30 }
 0x254   : > { %v676_v34 = vpop.xlane.xlu0 %675 }
 0x255   : > { %1022 = vpow2.f32 %v879_v32  ;;  %v679_v35 = vadd.f32 %v678_v31, %v676_v34 }
 0x256   : > { %1024 = vpow2.f32 %v878_v33 }
 0x257   : > { %v882_v36 = vmul.f32 -1.442695, %v679_v35 }
 0x259   : > { %1026 = vpow2.f32 %v882_v36 }
 0x25f   : > { %v1023_v37 = vpop.eup %1022 }
 0x260   : > { %v1025_v38 = vpop.eup %1024  ;;  %v654_v40 = vadd.f32 1.0, %v1023_v37 }
 0x261   : > { %v631_v41 = vadd.f32 1.0, %v1025_v38 }
 0x262   : > { %1028 = vrcp.f32 %v654_v40 }
 0x263   : > { %v1027_v42 = vpop.eup %1026  ;;  %1030 = vrcp.f32 %v631_v41 }
 0x264   : > { %v683_v43 = vadd.f32 1.0, %v1027_v42 }
 0x266   : > { %1032 = vrcp.f32 %v683_v43 }
 0x26c   : > { %v1029_v46 = vpop.eup %1028 }
 0x26d   : > { %v1031_v47 = vpop.eup %1030 }
 0x26e   : > { %897 = vpush %v1031_v47 }
 0x26f   : > { %899 = vpush %v1029_v46 }
 0x270   : > { %v1033_v48 = vpop.eup %1032 }
 0x271   : > { %901 = vpush %v1033_v48 }
 0x29f   : > { %s898_s21 = spop %897 }
 0x2a0   : > { %v636_v49 = vstv %s898_s21  ;;  %s900_s12 = spop %899 }
 0x2a1   : > { %v638_v51 = vmul.f32 %v636_v49, %v1695_v21  ;;  %v639_v52 = vmul.f32 %v636_v49, %v1701_v26  ;;  %v661_v53 = vstv %s900_s12 }
 0x2a2   : > { %v663_v54 = vmul.f32 %v1720_v45, %v661_v53  ;;  %v664_v55 = vmul.f32 %v1728_v50, %v661_v53  ;;  %s902_s23 = spop %901 }
 0x2a3   : > { %v690_v56 = vstv %s902_s23 }
 0x2a4   : > { %v667_v57 = vadd.f32 %v663_v54, %v638_v51  ;;  %v668_v58 = vadd.f32 %v664_v55, %v639_v52  ;;  %v692_v59 = vmul.f32 %v1712_v39, %v690_v56  ;;  %v693_v21 = vmul.f32 %v1717_v44, %v690_v56 }
 0x2a6   : > { %v696_v60 = vadd.f32 %v692_v59, %v667_v57  ;;  %v697_v26 = vadd.f32 %v693_v21, %v668_v58 }
 0x2a8   : > { %698 = vst [vmem:[%s404_s0] sm:$0xff] %v696_v60  ;;  %699 = vst [vmem:[%s404_s0 + $0x8] sm:$0xff] %v697_v26 }
 0x2a9   : > { %1247 = shalt.err (!%p1244_p8)
}
 0x2aa   : > { %s1248_s17 = scalar_lea.hbm %s1771_s5, 256  ;;  %s1252_s20 = scalar_lea.hbm %s1822_s7, 512 }
 0x2ab   : > { %p1249_p11 = scmp.ne.s32.totalorder %s1771_s5, %s1248_s17  ;;  %p1253_p13 = scmp.lt.u32.totalorder %s1771_s5, %s1822_s7 }
 0x2ac   : > { %p1254_p1 = scmp.lt.u32.totalorder %s1252_s20, %s1248_s17  ;;  %p1256_p7 = scmp.lt.u32.totalorder %s1248_s17, %s1771_s5 }
 0x2ad   : > { %p1250_p0 = pnand %p1249_p11, %p1858_p2 }
 0x2ae   : > { %p1255_p3 = por %p1254_p1, %p1253_p13 }
 0x2af   : > { %p1251_p12 = pneg %p1250_p0 }
 0x2b0   : > { %p1257_p6 = por %p1256_p7, %p1255_p3 }
 0x2b2   : > { %p1258_p10 = pnand %p1257_p6, %p1251_p12 }
 0x2b4   : > { %1261 = shalt.err (!%p1258_p10)
}
 0x2b5   : > { %927 = dma.vmem_to_hbm [thread:$0]  (%p1858_p2), %s1773_s14, 256, %s1771_s5, %s701_s30  }
 0x2b6 PF: > { %s727_s21 = sand.u32 1, %s1304_s24   ;;  %p1859_p5 = scmp.ne.s32.totalorder %s1844_s15, 0 }
 0x2b7   : > { %p1860_p9 = scmp.ge.s32.totalorder %s1316_s27, 2  ;;  %s728_s12 = scalar_lea.sflag [#allocation4], %s727_s21 }
 0x2b9   : > { %p953_p4 = pnand %p1860_p9, %p1859_p5 }
 0x2bb   : > { %1299 = dma.done.wait (!%p953_p4), %s728_s12, 256  }
 0x2bc   : > { %1301 = vsyncadd (!%p953_p4), %s728_s12, 4294967040  ;;  %p25_p8 = scmp.ge.s32.totalorder %s1540_s19, 4   ;;  %s1861_s24 = smov %s1308_s25 }
 0x2bd   : > { %s1862_s25 = smov %s1312_s26  ;;  %s1863_s26 = smov %s1552_s2 }
 0x2be   : > { %s1864_s27 = smov %s1540_s19  ;;  %27 = sbr.rel (!%p25_p8) target bundleno = 15 (0xf), region = 136 }
 0x2c5   :  { %733 = vsyncpa [#allocation3], 1 }
 0x2c6   :  { %735 = vsyncpa [#allocation3 + $0x1], 1 }
 0x2c7   :  { %736 = vsyncpa [#allocation6], 1 }
 0x2c8   :  { %738 = vsyncpa [#allocation6 + $0x1], 1 }
 0x2c9   :  { %739 = vsyncpa [#allocation9], 1 }
 0x2ca   :  { %740 = vsyncpa [#allocation12], 1 }
 0x2cb   :  { %741 = vsyncpa [#allocation4], 1 }
 0x2cc   :  { %743 = vsyncpa [#allocation4 + $0x1], 1 }

</bundles_post_ra>
